<compile_context>
chip_gen: v7x
topology: tpu7x:2x2x1
jax: 0.10.0
libtpu: 0.0.40
codegen_flags: <defaults>
</compile_context>

<pallas_src>
import functools

import jax
import jax.numpy as jnp
import numpy as np
from jax.experimental import pallas as pl
from jax.experimental.pallas import tpu as pltpu


# ----------------------------- Pallas kernel ------------------------------- #

def _up_projection_kernel(x_ref, up_ref, w5_ref, b1_ref, mask_ref,
                          w3_ref, b2_ref, out_ref, *, H, W):
    # x_ref   : (1, Cin_p, h0*w0)     input image (channels on sublanes), f32
    # up_ref  : (h0*w0, (H+8)*wp)     bilinear upsample + conv5 halo matrix, f32
    # w5_ref  : (Cout, 25*Cin_p)      im2col conv5 weights * BN1 scale, bf16
    # b1_ref  : (Cout, 1)             folded BN1 bias, f32
    # mask_ref: (1, (H+3)*wp)         0/1 lane mask (valid rows 1..H, cols 1..W)
    # w3_ref  : (Cout, 9*Cout)        im2col conv3 weights * BN2 scale, bf16
    # b2_ref  : (Cout, 1)             folded BN2 bias, f32
    # out_ref : (1, Cout, H*wp)       relu(x1 + x2) in the gutter domain, f32
    wp = W + 4               # unified gutter width (room for conv5's +/-2 halo)
    L5 = (H + 3) * wp        # conv5 output extent: 1 halo row top+bottom +1 spare
    Lo = H * wp              # conv3 / residual output extent

    # Bilinear upsample + zero halo: one small MXU matmul (kept f32 for exact
    # interpolation weights; conv matmuls below are the bf16 ones).
    xpad = jnp.dot(x_ref[0], up_ref[...],
                   preferred_element_type=jnp.float32)      # (Cin_p, (H+8)*wp)

    # conv5x5 as ONE im2col matmul over the flat gutter domain.  Image pixel
    # (i, j) lands at flat position (i+1)*wp + (j+1); everything else is junk
    # that the lane mask / wrapper slice remove.
    cols5 = [xpad[:, kh * wp + kw: kh * wp + kw + L5]
             for kh in range(5) for kw in range(5)]
    patches5 = jnp.concatenate(cols5, axis=0).astype(jnp.bfloat16)  # (25*Cin_p, L5)
    x1 = jnp.dot(w5_ref[...], patches5,
                 preferred_element_type=jnp.float32)         # (Cout, L5)
    x1 = x1 + b1_ref[...]                                    # BN1 (scale folded)

    # layer2: ReLU -> one VPU mask multiply (zeroes halo rows + gutter cols,
    # which doubles as the conv3 zero padding) -> conv3x3 im2col -> BN2 bias.
    r = jnp.maximum(x1, 0.0) * mask_ref[...]                 # (Cout, L5), f32
    cols3 = [r[:, dh * wp + dw: dh * wp + dw + Lo]
             for dh in range(3) for dw in range(3)]
    patches3 = jnp.concatenate(cols3, axis=0).astype(jnp.bfloat16)  # (9*Cout, Lo)
    x2 = jnp.dot(w3_ref[...], patches3,
                 preferred_element_type=jnp.float32)         # (Cout, Lo)
    x2 = x2 + b2_ref[...]                                    # BN2 (scale folded)

    # Residual add (x1 is pre-ReLU layer1 output, realigned by one static
    # lane slice) + final ReLU.  Gutter columns are dropped in the wrapper.
    x1v = x1[:, wp + 1: wp + 1 + Lo]                         # (Cout, Lo)
    out_ref[0] = jnp.maximum(x1v + x2, 0.0)


# ------------------------------ JAX wrapper -------------------------------- #

def _bilinear_matrix(out_size, in_size):
    """(out_size, in_size) bilinear interpolation matrix, align_corners=False."""
    scale = in_size / out_size
    s = (jnp.arange(out_size, dtype=jnp.float32) + 0.5) * scale - 0.5
    s = jnp.clip(s, 0.0, in_size - 1)
    i0 = jnp.floor(s).astype(jnp.int32)
    i1 = jnp.minimum(i0 + 1, in_size - 1)
    f = (s - i0.astype(jnp.float32))[:, None]
    return (jax.nn.one_hot(i0, in_size, dtype=jnp.float32) * (1.0 - f)
            + jax.nn.one_hot(i1, in_size, dtype=jnp.float32) * f)


def up_projection(x_nchw, size, params):
    """Forward pass of UpProjection. x_nchw: (N, Cin, h0, w0); size=(H, W)."""
    H, W = size
    n, cin, h0, w0 = x_nchw.shape
    cout = params["w5"].shape[-1]
    cin_p = ((cin + 7) // 8) * 8          # sublane-align the im2col K blocks
    wp = W + 4
    L5 = (H + 3) * wp
    Lo = H * wp

    # ---- wrapper-side precompute (constant-folded under jit) -------------- #
    # Upsample matrix with halo: image row i -> buffer row i+3, col j -> j+3.
    a_h = jnp.pad(_bilinear_matrix(H, h0), ((3, 5), (0, 0)))        # (H+8, h0)
    a_w = jnp.pad(_bilinear_matrix(W, w0), ((3, 1), (0, 0)))        # (W+4, w0)
    up_t = jnp.kron(a_h, a_w).T.astype(jnp.float32)      # (h0*w0, (H+8)*wp)

    # 0/1 lane mask over the conv5 output domain: valid rows 1..H, cols 1..W.
    row_ok = (jnp.arange(H + 3) >= 1) & (jnp.arange(H + 3) <= H)
    col_ok = (jnp.arange(wp) >= 1) & (jnp.arange(wp) <= W)
    mask = (row_ok[:, None] & col_ok[None, :]).astype(jnp.float32).reshape(1, L5)

    # im2col weights, BN scales folded in, bf16 for the MXU.
    w5p = jnp.pad(params["w5"], ((0, 0), (0, 0), (0, cin_p - cin), (0, 0)))
    w5m = ((w5p.reshape(5 * 5 * cin_p, cout) * params["scale1"][None, :]).T
           ).astype(jnp.bfloat16)                        # (Cout, 25*Cin_p)
    w3m = ((params["w3"].reshape(3 * 3 * cout, cout) * params["scale2"][None, :]).T
           ).astype(jnp.bfloat16)                        # (Cout, 9*Cout)
    b1 = params["bias1"].reshape(cout, 1).astype(jnp.float32)
    b2 = params["bias2"].reshape(cout, 1).astype(jnp.float32)

    x_flat = jnp.pad(x_nchw.astype(jnp.float32),
                     ((0, 0), (0, cin_p - cin), (0, 0), (0, 0)))
    x_flat = x_flat.reshape(n, cin_p, h0 * w0)

    bcast = lambda i: (0, 0)
    out_flat = pl.pallas_call(
        functools.partial(_up_projection_kernel, H=H, W=W),
        out_shape=jax.ShapeDtypeStruct((n, cout, Lo), jnp.float32),
        grid=(n,),
        in_specs=[
            pl.BlockSpec((1, cin_p, h0 * w0), lambda i: (i, 0, 0)),
            pl.BlockSpec(up_t.shape, bcast),
            pl.BlockSpec(w5m.shape, bcast),
            pl.BlockSpec((cout, 1), bcast),
            pl.BlockSpec(mask.shape, bcast),
            pl.BlockSpec(w3m.shape, bcast),
            pl.BlockSpec((cout, 1), bcast),
        ],
        out_specs=pl.BlockSpec((1, cout, Lo), lambda i: (i, 0, 0)),
        compiler_params=pltpu.CompilerParams(
            dimension_semantics=("parallel",),
            vmem_limit_bytes=32 * 1024 * 1024),
    )(x_flat, up_t, w5m, b1, mask, w3m, b2)

    # Drop the gutter columns: free reshape + slice on the wrapper side.
    return out_flat.reshape(n, cout, H, wp)[..., :W]


# ------------------------- params / pure-JAX reference --------------------- #

def init_params(key, in_channel, out_channel):
    """Deterministic synthetic parameters (HWIO conv weights, folded BN)."""
    ks = jax.random.split(key, 10)
    w5 = 0.1 * jax.random.normal(ks[0], (5, 5, in_channel, out_channel),
                                 jnp.float32)
    w3 = 0.1 * jax.random.normal(ks[1], (3, 3, out_channel, out_channel),
                                 jnp.float32)
    eps = 1e-5

    def fold_bn(gk, bk, mk, vk):
        gamma = 1.0 + 0.1 * jax.random.normal(gk, (out_channel,), jnp.float32)
        beta = 0.1 * jax.random.normal(bk, (out_channel,), jnp.float32)
        mean = 0.1 * jax.random.normal(mk, (out_channel,), jnp.float32)
        var = jnp.abs(1.0 + 0.1 * jax.random.normal(vk, (out_channel,),
                                                    jnp.float32))
        scale = gamma / jnp.sqrt(var + eps)
        bias = beta - mean * scale
        return scale, bias

    scale1, bias1 = fold_bn(ks[2], ks[3], ks[4], ks[5])
    scale2, bias2 = fold_bn(ks[6], ks[7], ks[8], ks[9])
    return dict(w5=w5, w3=w3, scale1=scale1, bias1=bias1,
                scale2=scale2, bias2=bias2)


def _bilinear_upsample_nhwc(x, out_h, out_w):
    """PyTorch F.upsample(mode='bilinear'), align_corners=False (gather ref)."""
    n, h, w, c = x.shape

    def src_coords(out_size, in_size):
        scale = in_size / out_size
        s = (jnp.arange(out_size, dtype=jnp.float32) + 0.5) * scale - 0.5
        s = jnp.clip(s, 0.0, in_size - 1)
        i0 = jnp.floor(s).astype(jnp.int32)
        i1 = jnp.minimum(i0 + 1, in_size - 1)
        f = s - i0.astype(jnp.float32)
        return i0, i1, f

    h0, h1, hf = src_coords(out_h, h)
    w0, w1, wf = src_coords(out_w, w)
    hf = hf[None, :, None, None]
    wf = wf[None, None, :, None]

    def g(hi, wi):
        return x[:, hi][:, :, wi]

    top = (1.0 - wf) * g(h0, w0) + wf * g(h0, w1)
    bot = (1.0 - wf) * g(h1, w0) + wf * g(h1, w1)
    return (1.0 - hf) * top + hf * bot


def _reference(x_nchw, size, params):
    """Pure-JAX reference for correctness checking (f32)."""
    x = jnp.transpose(x_nchw, (0, 2, 3, 1)).astype(jnp.float32)
    x_up = _bilinear_upsample_nhwc(x, *size)

    def conv(inp, w):
        return jax.lax.conv_general_dilated(
            inp, w, window_strides=(1, 1), padding="SAME",
            dimension_numbers=("NHWC", "HWIO", "NHWC"))

    x1 = conv(x_up, params["w5"]) * params["scale1"] + params["bias1"]
    x2 = (conv(jnp.maximum(x1, 0.0), params["w3"]) * params["scale2"]
          + params["bias2"])
    out = jnp.maximum(x1 + x2, 0.0)
    return jnp.transpose(out, (0, 3, 1, 2))


# --------------------------------- main ------------------------------------ #

if __name__ == "__main__":
    key = jax.random.PRNGKey(0)
    kx, kp = jax.random.split(key)

    in_channel, out_channel = 4, 8
    x = jax.random.normal(kx, (2, in_channel, 8, 8), jnp.float32)   # NCHW
    size = (16, 16)                                                 # upsample target
    params = init_params(kp, in_channel, out_channel)

    fwd = jax.jit(functools.partial(up_projection, size=size, params=params))
    out = jax.block_until_ready(fwd(x))

    assert out.shape == (2, out_channel, 16, 16), out.shape
    ref = jax.block_until_ready(_reference(x, size, params))
    # bf16 MXU operands in the kernel (f32 accumulate) vs. f32 reference:
    # tolerance widened accordingly.
    np.testing.assert_allclose(np.asarray(out), np.asarray(ref),
                               atol=5e-2, rtol=5e-2)
    print("KERNEL_OK")
</pallas_src>

<mosaic_0001>
module attributes {stable_mosaic.version = 11 : i64} {
  func.func @_up_projection_kernel(%arg0: i32, %arg1: memref<1x8x64xf32, #tpu.memory_space<vmem>>, %arg2: memref<64x480xf32, #tpu.memory_space<vmem>>, %arg3: memref<8x200xbf16, #tpu.memory_space<vmem>>, %arg4: memref<8x1xf32, #tpu.memory_space<vmem>>, %arg5: memref<1x380xf32, #tpu.memory_space<vmem>>, %arg6: memref<8x72xbf16, #tpu.memory_space<vmem>>, %arg7: memref<8x1xf32, #tpu.memory_space<vmem>>, %arg8: memref<1x8x320xf32, #tpu.memory_space<vmem>>) attributes {dimension_semantics = [#tpu.dimension_semantics<parallel>], iteration_bounds = array<i64: 2>, scalar_prefetch = 0 : i64, scratch_operands = 0 : i64, tpu.core_type = #tpu.core_type<tc>, window_params = [{transform_indices = @transform_0, window_bounds = array<i64: 1, 8, 64>}, {pipeline_mode = #tpu.pipeline_mode<synchronous>, transform_indices = @transform_1, window_bounds = array<i64: 64, 480>}, {pipeline_mode = #tpu.pipeline_mode<synchronous>, transform_indices = @transform_2, window_bounds = array<i64: 8, 200>}, {pipeline_mode = #tpu.pipeline_mode<synchronous>, transform_indices = @transform_3, window_bounds = array<i64: 8, 1>}, {pipeline_mode = #tpu.pipeline_mode<synchronous>, transform_indices = @transform_4, window_bounds = array<i64: 1, 380>}, {pipeline_mode = #tpu.pipeline_mode<synchronous>, transform_indices = @transform_5, window_bounds = array<i64: 8, 72>}, {pipeline_mode = #tpu.pipeline_mode<synchronous>, transform_indices = @transform_6, window_bounds = array<i64: 8, 1>}, {transform_indices = @transform_7, window_bounds = array<i64: 1, 8, 320>}]} {
    %c0 = arith.constant 0 : index
    %c0_0 = arith.constant 0 : index
    %c0_1 = arith.constant 0 : index
    %0 = vector.load %arg1[%c0, %c0_0, %c0_1] : memref<1x8x64xf32, #tpu.memory_space<vmem>>, vector<1x8x64xf32>
    %1 = vector.shape_cast %0 : vector<1x8x64xf32> to vector<8x64xf32>
    %c0_2 = arith.constant 0 : index
    %c0_3 = arith.constant 0 : index
    %2 = vector.load %arg2[%c0_2, %c0_3] : memref<64x480xf32, #tpu.memory_space<vmem>>, vector<64x480xf32>
    %cst = arith.constant dense<0.000000e+00> : vector<8x480xf32>
    %3 = tpu.matmul %1, %2, %cst {dimension_numbers = #tpu.dot_dimension_numbers<[1], [0], [0], [1], [0, 0, 1, 1], [], []>} : vector<8x64xf32>, vector<64x480xf32>, vector<8x480xf32> -> vector<8x480xf32>
    %4 = vector.extract_strided_slice %3 {offsets = [0, 0], sizes = [8, 380], strides = [1, 1]} : vector<8x480xf32> to vector<8x380xf32>
    %5 = vector.extract_strided_slice %3 {offsets = [0, 1], sizes = [8, 380], strides = [1, 1]} : vector<8x480xf32> to vector<8x380xf32>
    %6 = vector.extract_strided_slice %3 {offsets = [0, 2], sizes = [8, 380], strides = [1, 1]} : vector<8x480xf32> to vector<8x380xf32>
    %7 = vector.extract_strided_slice %3 {offsets = [0, 3], sizes = [8, 380], strides = [1, 1]} : vector<8x480xf32> to vector<8x380xf32>
    %8 = vector.extract_strided_slice %3 {offsets = [0, 4], sizes = [8, 380], strides = [1, 1]} : vector<8x480xf32> to vector<8x380xf32>
    %9 = vector.extract_strided_slice %3 {offsets = [0, 20], sizes = [8, 380], strides = [1, 1]} : vector<8x480xf32> to vector<8x380xf32>
    %10 = vector.extract_strided_slice %3 {offsets = [0, 21], sizes = [8, 380], strides = [1, 1]} : vector<8x480xf32> to vector<8x380xf32>
    %11 = vector.extract_strided_slice %3 {offsets = [0, 22], sizes = [8, 380], strides = [1, 1]} : vector<8x480xf32> to vector<8x380xf32>
    %12 = vector.extract_strided_slice %3 {offsets = [0, 23], sizes = [8, 380], strides = [1, 1]} : vector<8x480xf32> to vector<8x380xf32>
    %13 = vector.extract_strided_slice %3 {offsets = [0, 24], sizes = [8, 380], strides = [1, 1]} : vector<8x480xf32> to vector<8x380xf32>
    %14 = vector.extract_strided_slice %3 {offsets = [0, 40], sizes = [8, 380], strides = [1, 1]} : vector<8x480xf32> to vector<8x380xf32>
    %15 = vector.extract_strided_slice %3 {offsets = [0, 41], sizes = [8, 380], strides = [1, 1]} : vector<8x480xf32> to vector<8x380xf32>
    %16 = vector.extract_strided_slice %3 {offsets = [0, 42], sizes = [8, 380], strides = [1, 1]} : vector<8x480xf32> to vector<8x380xf32>
    %17 = vector.extract_strided_slice %3 {offsets = [0, 43], sizes = [8, 380], strides = [1, 1]} : vector<8x480xf32> to vector<8x380xf32>
    %18 = vector.extract_strided_slice %3 {offsets = [0, 44], sizes = [8, 380], strides = [1, 1]} : vector<8x480xf32> to vector<8x380xf32>
    %19 = vector.extract_strided_slice %3 {offsets = [0, 60], sizes = [8, 380], strides = [1, 1]} : vector<8x480xf32> to vector<8x380xf32>
    %20 = vector.extract_strided_slice %3 {offsets = [0, 61], sizes = [8, 380], strides = [1, 1]} : vector<8x480xf32> to vector<8x380xf32>
    %21 = vector.extract_strided_slice %3 {offsets = [0, 62], sizes = [8, 380], strides = [1, 1]} : vector<8x480xf32> to vector<8x380xf32>
    %22 = vector.extract_strided_slice %3 {offsets = [0, 63], sizes = [8, 380], strides = [1, 1]} : vector<8x480xf32> to vector<8x380xf32>
    %23 = vector.extract_strided_slice %3 {offsets = [0, 64], sizes = [8, 380], strides = [1, 1]} : vector<8x480xf32> to vector<8x380xf32>
    %24 = vector.extract_strided_slice %3 {offsets = [0, 80], sizes = [8, 380], strides = [1, 1]} : vector<8x480xf32> to vector<8x380xf32>
    %25 = vector.extract_strided_slice %3 {offsets = [0, 81], sizes = [8, 380], strides = [1, 1]} : vector<8x480xf32> to vector<8x380xf32>
    %26 = vector.extract_strided_slice %3 {offsets = [0, 82], sizes = [8, 380], strides = [1, 1]} : vector<8x480xf32> to vector<8x380xf32>
    %27 = vector.extract_strided_slice %3 {offsets = [0, 83], sizes = [8, 380], strides = [1, 1]} : vector<8x480xf32> to vector<8x380xf32>
    %28 = vector.extract_strided_slice %3 {offsets = [0, 84], sizes = [8, 380], strides = [1, 1]} : vector<8x480xf32> to vector<8x380xf32>
    %29 = tpu.concatenate %4, %5, %6, %7, %8, %9, %10, %11, %12, %13, %14, %15, %16, %17, %18, %19 in 0 : vector<8x380xf32>, vector<8x380xf32>, vector<8x380xf32>, vector<8x380xf32>, vector<8x380xf32>, vector<8x380xf32>, vector<8x380xf32>, vector<8x380xf32>, vector<8x380xf32>, vector<8x380xf32>, vector<8x380xf32>, vector<8x380xf32>, vector<8x380xf32>, vector<8x380xf32>, vector<8x380xf32>, vector<8x380xf32> -> vector<128x380xf32>
    %30 = tpu.concatenate %20, %21, %22, %23, %24, %25, %26, %27, %28 in 0 : vector<8x380xf32>, vector<8x380xf32>, vector<8x380xf32>, vector<8x380xf32>, vector<8x380xf32>, vector<8x380xf32>, vector<8x380xf32>, vector<8x380xf32>, vector<8x380xf32> -> vector<72x380xf32>
    %31 = tpu.concatenate %29, %30 in 0 : vector<128x380xf32>, vector<72x380xf32> -> vector<200x380xf32>
    %32 = arith.truncf %31 : vector<200x380xf32> to vector<200x380xbf16>
    %c0_4 = arith.constant 0 : index
    %c0_5 = arith.constant 0 : index
    %33 = vector.load %arg3[%c0_4, %c0_5] : memref<8x200xbf16, #tpu.memory_space<vmem>>, vector<8x200xbf16>
    %cst_6 = arith.constant dense<0.000000e+00> : vector<8x380xf32>
    %34 = tpu.matmul %33, %32, %cst_6 {dimension_numbers = #tpu.dot_dimension_numbers<[1], [0], [0], [1], [0, 0, 1, 1], [], []>} : vector<8x200xbf16>, vector<200x380xbf16>, vector<8x380xf32> -> vector<8x380xf32>
    %c0_7 = arith.constant 0 : index
    %c0_8 = arith.constant 0 : index
    %35 = vector.load %arg4[%c0_7, %c0_8] : memref<8x1xf32, #tpu.memory_space<vmem>>, vector<8x1xf32>
    %36 = vector.broadcast %35 : vector<8x1xf32> to vector<8x380xf32>
    %37 = arith.addf %34, %36 : vector<8x380xf32>
    %cst_9 = arith.constant 0.000000e+00 : f32
    %38 = vector.broadcast %cst_9 : f32 to vector<8x380xf32>
    %39 = arith.maximumf %37, %38 : vector<8x380xf32>
    %c0_10 = arith.constant 0 : index
    %c0_11 = arith.constant 0 : index
    %40 = vector.load %arg5[%c0_10, %c0_11] : memref<1x380xf32, #tpu.memory_space<vmem>>, vector<1x380xf32>
    %41 = vector.broadcast %40 : vector<1x380xf32> to vector<8x380xf32>
    %42 = arith.mulf %39, %41 : vector<8x380xf32>
    %43 = vector.extract_strided_slice %42 {offsets = [0, 0], sizes = [8, 320], strides = [1, 1]} : vector<8x380xf32> to vector<8x320xf32>
    %44 = vector.extract_strided_slice %42 {offsets = [0, 1], sizes = [8, 320], strides = [1, 1]} : vector<8x380xf32> to vector<8x320xf32>
    %45 = vector.extract_strided_slice %42 {offsets = [0, 2], sizes = [8, 320], strides = [1, 1]} : vector<8x380xf32> to vector<8x320xf32>
    %46 = vector.extract_strided_slice %42 {offsets = [0, 20], sizes = [8, 320], strides = [1, 1]} : vector<8x380xf32> to vector<8x320xf32>
    %47 = vector.extract_strided_slice %42 {offsets = [0, 21], sizes = [8, 320], strides = [1, 1]} : vector<8x380xf32> to vector<8x320xf32>
    %48 = vector.extract_strided_slice %42 {offsets = [0, 22], sizes = [8, 320], strides = [1, 1]} : vector<8x380xf32> to vector<8x320xf32>
    %49 = vector.extract_strided_slice %42 {offsets = [0, 40], sizes = [8, 320], strides = [1, 1]} : vector<8x380xf32> to vector<8x320xf32>
    %50 = vector.extract_strided_slice %42 {offsets = [0, 41], sizes = [8, 320], strides = [1, 1]} : vector<8x380xf32> to vector<8x320xf32>
    %51 = vector.extract_strided_slice %42 {offsets = [0, 42], sizes = [8, 320], strides = [1, 1]} : vector<8x380xf32> to vector<8x320xf32>
    %52 = tpu.concatenate %43, %44, %45, %46, %47, %48, %49, %50, %51 in 0 : vector<8x320xf32>, vector<8x320xf32>, vector<8x320xf32>, vector<8x320xf32>, vector<8x320xf32>, vector<8x320xf32>, vector<8x320xf32>, vector<8x320xf32>, vector<8x320xf32> -> vector<72x320xf32>
    %53 = arith.truncf %52 : vector<72x320xf32> to vector<72x320xbf16>
    %c0_12 = arith.constant 0 : index
    %c0_13 = arith.constant 0 : index
    %54 = vector.load %arg6[%c0_12, %c0_13] : memref<8x72xbf16, #tpu.memory_space<vmem>>, vector<8x72xbf16>
    %cst_14 = arith.constant dense<0.000000e+00> : vector<8x320xf32>
    %55 = tpu.matmul %54, %53, %cst_14 {dimension_numbers = #tpu.dot_dimension_numbers<[1], [0], [0], [1], [0, 0, 1, 1], [], []>} : vector<8x72xbf16>, vector<72x320xbf16>, vector<8x320xf32> -> vector<8x320xf32>
    %c0_15 = arith.constant 0 : index
    %c0_16 = arith.constant 0 : index
    %56 = vector.load %arg7[%c0_15, %c0_16] : memref<8x1xf32, #tpu.memory_space<vmem>>, vector<8x1xf32>
    %57 = vector.broadcast %56 : vector<8x1xf32> to vector<8x320xf32>
    %58 = arith.addf %55, %57 : vector<8x320xf32>
    %59 = vector.extract_strided_slice %37 {offsets = [0, 21], sizes = [8, 320], strides = [1, 1]} : vector<8x380xf32> to vector<8x320xf32>
    %60 = arith.addf %59, %58 : vector<8x320xf32>
    %cst_17 = arith.constant 0.000000e+00 : f32
    %61 = vector.broadcast %cst_17 : f32 to vector<8x320xf32>
    %62 = arith.maximumf %60, %61 : vector<8x320xf32>
    %c0_18 = arith.constant 0 : index
    %c0_19 = arith.constant 0 : index
    %c0_20 = arith.constant 0 : index
    %63 = vector.load %arg8[%c0_18, %c0_19, %c0_20] : memref<1x8x320xf32, #tpu.memory_space<vmem>>, vector<1x8x320xf32>
    %64 = vector.shape_cast %63 : vector<1x8x320xf32> to vector<8x320xf32>
    %65 = vector.shape_cast %62 : vector<8x320xf32> to vector<1x8x320xf32>
    tpu.vector_store %arg8[%c0_18, %c0_19, %c0_20], %65 {strides = array<i32>} : memref<1x8x320xf32, #tpu.memory_space<vmem>>, vector<1x8x320xf32>,
    return
  }
  func.func @transform_0(%arg0: i32) -> (i32, i32, i32) {
    %c0_i32 = arith.constant 0 : i32
    %c0_i32_0 = arith.constant 0 : i32
    %c0_i32_1 = arith.constant 0 : i32
    return %arg0, %c0_i32, %c0_i32_0 : i32, i32, i32
  }
  func.func @transform_1(%arg0: i32) -> (i32, i32) {
    %c0_i32 = arith.constant 0 : i32
    %c0_i32_0 = arith.constant 0 : i32
    %c0_i32_1 = arith.constant 0 : i32
    return %c0_i32, %c0_i32_0 : i32, i32
  }
  func.func @transform_2(%arg0: i32) -> (i32, i32) {
    %c0_i32 = arith.constant 0 : i32
    %c0_i32_0 = arith.constant 0 : i32
    %c0_i32_1 = arith.constant 0 : i32
    return %c0_i32, %c0_i32_0 : i32, i32
  }
  func.func @transform_3(%arg0: i32) -> (i32, i32) {
    %c0_i32 = arith.constant 0 : i32
    %c0_i32_0 = arith.constant 0 : i32
    %c0_i32_1 = arith.constant 0 : i32
    return %c0_i32, %c0_i32_0 : i32, i32
  }
  func.func @transform_4(%arg0: i32) -> (i32, i32) {
    %c0_i32 = arith.constant 0 : i32
    %c0_i32_0 = arith.constant 0 : i32
    %c0_i32_1 = arith.constant 0 : i32
    return %c0_i32, %c0_i32_0 : i32, i32
  }
  func.func @transform_5(%arg0: i32) -> (i32, i32) {
    %c0_i32 = arith.constant 0 : i32
    %c0_i32_0 = arith.constant 0 : i32
    %c0_i32_1 = arith.constant 0 : i32
    return %c0_i32, %c0_i32_0 : i32, i32
  }
  func.func @transform_6(%arg0: i32) -> (i32, i32) {
    %c0_i32 = arith.constant 0 : i32
    %c0_i32_0 = arith.constant 0 : i32
    %c0_i32_1 = arith.constant 0 : i32
    return %c0_i32, %c0_i32_0 : i32, i32
  }
  func.func @transform_7(%arg0: i32) -> (i32, i32, i32) {
    %c0_i32 = arith.constant 0 : i32
    %c0_i32_0 = arith.constant 0 : i32
    %c0_i32_1 = arith.constant 0 : i32
    return %arg0, %c0_i32, %c0_i32_0 : i32, i32, i32
  }
}

</mosaic_0001>

<bundles_post_ra>
// kernel: up_projection.1
= control target key start
LH: loop header
LB: loop body
LE: loop exit
PB: predicated region body
PF: predicated region fallthrough
CT: control target
= control target key end

     0   :  { %s1748_s24 = smov 0   ;;  %s2215_s0 = inlined_call_operand.vmem [shape: f32[2,8,64], index: 0, kind: input, shape index: {}]   ;;  %s2216_s1 = inlined_call_operand.vmem [shape: f32[64,480], index: 1, kind: input, shape index: {}]   ;;  %s2217_s2 = inlined_call_operand.vmem [shape: bf16[8,200], index: 2, kind: input, shape index: {}]   ;;  %s2218_s3 = inlined_call_operand.vmem [shape: f32[8,1], index: 3, kind: input, shape index: {}]   ;;  %s2219_s4 = inlined_call_operand.vmem [shape: f32[1,380], index: 4, kind: input, shape index: {}]   ;;  %s2220_s5 = inlined_call_operand.vmem [shape: bf16[8,72], index: 5, kind: input, shape index: {}]   ;;  %s2221_s6 = inlined_call_operand.vmem [shape: f32[8,1], index: 6, kind: input, shape index: {}]   ;;  %s2222_s7 = inlined_call_operand.vmem [shape: f32[2,8,320], index: 7, kind: output, shape index: {}]  }
   0x1 LB: > { %s1290_s25 = sadd.s32 4294967295, %s1685_s24   ;;  %p1294_p0 = scmp.ge.s32.totalorder %s1685_s24, 1  ;;  %s1685_s24 = sphi %s1748_s24, %s17_s24  }
   0x2   : > { %p236_p1 = scmp.lt.s32.totalorder %s1685_s24, 3 }
   0x4   : > { %p237_p2 = pnand %p1294_p0, %p236_p1 }
   0x5   : > { %v279_v0 = vld [vmem:[%s2216_s1 + $0x8] sm:$0xff] (!%p237_p2)  ;;  %v281_v2 = vld [vmem:[%s2216_s1 + $0x18] sm:$0xff] (!%p237_p2)  ;;  %v278_v5 = vld [vmem:[%s2216_s1] sm:$0xff] (!%p237_p2)  ;;  %v1687_v7 = vmov (!%p237_p2), 0.0   ;;  %p1787_p3 = scmp.lt.s32.totalorder (!%p237_p2), %s1290_s25, 1  ;;  %vm310_vm0 = vcmask (!%p237_p2), 523264  }
   0x6   : > { %240 = sbr.rel (%p237_p2) target bundleno = 1357 (0x54d), region = 48  ;;  %v283_v1 = vld [vmem:[%s2216_s1 + $0x28] sm:$0xff] (!%p237_p2)  ;;  %v285_v4 = vld [vmem:[%s2216_s1 + $0x38] sm:$0xff] (!%p237_p2)  ;;  %v282_v6 = vld [vmem:[%s2216_s1 + $0x20] sm:$0xff] (!%p237_p2)  ;;  %378 = vmatprep.mubr.f32.mxu0 (!%p237_p2), %v1687_v7  ;;  %449 = vmatprep.mubr.f32.mxu1 (!%p237_p2), %v1687_v7  ;;  %v1688_v50 = vmov (!%p237_p2), 0   ;;  %s1689_s10 = smov (!%p237_p2), 124  }
   0x7   : > { %v1329_v3 = vpack.c.bf16 (!%p237_p2), %v283_v1, %v279_v0  ;;  %v1345_v8 = vpack.c.bf16 (!%p237_p2), %v285_v4, %v281_v2  ;;  %v1331_v9 = vpack.c.bf16 (!%p237_p2), %v282_v6, %v278_v5  ;;  %v280_v10 = vld [vmem:[%s2216_s1 + $0x10] sm:$0xff] (!%p237_p2)  ;;  %v287_v12 = vld [vmem:[%s2216_s1 + $0x48] sm:$0xff] (!%p237_p2)  ;;  %v289_v15 = vld [vmem:[%s2216_s1 + $0x58] sm:$0xff] (!%p237_p2)  ;;  %1636 = vset.pattern.permute.xlu0 (!%p237_p2), %v1688_v50  ;;  %s1690_s11 = smov (!%p237_p2), 127   ;;  %s1691_s21 = smov (!%p237_p2), 126   ;;  %vm465_vm1 = vcmask (!%p237_p2), 1039360  }
   0x8   : > { %v284_v11 = vld [vmem:[%s2216_s1 + $0x30] sm:$0xff] (!%p237_p2)  ;;  %v291_v14 = vld [vmem:[%s2216_s1 + $0x68] sm:$0xff] (!%p237_p2)  ;;  %v293_v16 = vld [vmem:[%s2216_s1 + $0x78] sm:$0xff] (!%p237_p2)  ;;  %s1692_s12 = smov (!%p237_p2), 125   ;;  %s1693_s13 = smov (!%p237_p2), 108   ;;  %vm477_vm2 = vcmask (!%p237_p2), 1031168  }
   0x9   : > { %1330 = vmatprep.subr.bf16.mxu0 (!%p237_p2), %v1329_v3  ;;  %v1347_v13 = vpack.c.bf16 (!%p237_p2), %v284_v11, %v280_v10  ;;  %1346 = vmatprep.subr.bf16.mxu1 (!%p237_p2), %v1345_v8  ;;  %v1333_v17 = vpack.c.bf16 (!%p237_p2), %v291_v14, %v287_v12  ;;  %v1349_v18 = vpack.c.bf16 (!%p237_p2), %v293_v16, %v289_v15  ;;  %v286_v19 = vld [vmem:[%s2216_s1 + $0x40] sm:$0xff] (!%p237_p2)  ;;  %v288_v21 = vld [vmem:[%s2216_s1 + $0x50] sm:$0xff] (!%p237_p2)  ;;  %v295_v24 = vld [vmem:[%s2216_s1 + $0x88] sm:$0xff] (!%p237_p2)  ;;  %s1694_s14 = smov (!%p237_p2), 109   ;;  %s1695_s15 = smov (!%p237_p2), 107   ;;  %vm489_vm3 = vcmask (!%p237_p2), 1022976  }
   0xa   : > { %1332 = vmatpush1.bf16.msra.mxu0 (!%p237_p2), %v1331_v9  ;;  %v290_v20 = vld [vmem:[%s2216_s1 + $0x60] sm:$0xff] (!%p237_p2)  ;;  %v292_v23 = vld [vmem:[%s2216_s1 + $0x70] sm:$0xff] (!%p237_p2)  ;;  %v299_v25 = vld [vmem:[%s2216_s1 + $0xa8] sm:$0xff] (!%p237_p2)  ;;  %s1696_s16 = smov (!%p237_p2), 106   ;;  %s1697_s17 = smov (!%p237_p2), 105   ;;  %vm690_vm4 = vcmask (!%p237_p2), 891904  }
   0xb   : > { %1348 = vmatpush1.bf16.msra.mxu1 (!%p237_p2), %v1347_v13  ;;  %v1335_v22 = vpack.c.bf16 (!%p237_p2), %v290_v20, %v286_v19  ;;  %1334 = vmatprep.subr.bf16.mxu0 (!%p237_p2), %v1333_v17  ;;  %v1351_v26 = vpack.c.bf16 (!%p237_p2), %v292_v23, %v288_v21  ;;  %v1337_v27 = vpack.c.bf16 (!%p237_p2), %v299_v25, %v295_v24  ;;  %v297_v28 = vld [vmem:[%s2216_s1 + $0x98] sm:$0xff] (!%p237_p2)  ;;  %v294_v30 = vld [vmem:[%s2216_s1 + $0x80] sm:$0xff] (!%p237_p2)  ;;  %v296_v33 = vld [vmem:[%s2216_s1 + $0x90] sm:$0xff] (!%p237_p2)  ;;  %s1698_s18 = smov (!%p237_p2), 104   ;;  %s1699_s19 = smov (!%p237_p2), 87   ;;  %vm516_vm5 = vcmask (!%p237_p2), 883712  }
   0xc   : > { %1350 = vmatprep.subr.bf16.mxu1 (!%p237_p2), %v1349_v18  ;;  %v301_v29 = vld [vmem:[%s2216_s1 + $0xb8] sm:$0xff] (!%p237_p2)  ;;  %v298_v32 = vld [vmem:[%s2216_s1 + $0xa0] sm:$0xff] (!%p237_p2)  ;;  %v300_v34 = vld [vmem:[%s2216_s1 + $0xb0] sm:$0xff] (!%p237_p2)  ;;  %s1700_s20 = smov (!%p237_p2), 88   ;;  %s1701_s22 = smov (!%p237_p2), 85   ;;  %vm531_vm6 = vcmask (!%p237_p2), 875520  }
   0xd   : > { %s2225_s25 = smov (!%p1787_p3, %s1290_s25), 1  ;;  %v1353_v31 = vpack.c.bf16 %v301_v29, %v297_v28  ;;  %v1339_v35 = vpack.c.bf16 %v298_v32, %v294_v30  ;;  %v303_v36 = vld [vmem:[%s2216_s1 + $0xc8] sm:$0xff]  ;;  %v305_v38 = vld [vmem:[%s2216_s1 + $0xd8] sm:$0xff]  ;;  %v1355_v39 = vpack.c.bf16 %v300_v34, %v296_v33  ;;  %v302_v42 = vld [vmem:[%s2216_s1 + $0xc0] sm:$0xff]  ;;  %s1702_s23 = smov 86   ;;  %vm546_vm7 = vcmask 867328  }
   0xe   : > { %1336 = vmatpush1.bf16.msra.mxu0 %v1335_v22  ;;  %v307_v37 = vld [vmem:[%s2216_s1 + $0xe8] sm:$0xff]  ;;  %v309_v41 = vld [vmem:[%s2216_s1 + $0xf8] sm:$0xff]  ;;  %v306_v43 = vld [vmem:[%s2216_s1 + $0xe0] sm:$0xff]  ;;  %s1295_s29 = sshll.u32 %s2225_s25, 3  ;;  %s1703_s26 = smov 68   ;;  %vm561_vm8 = vcmask 859136  }
   0xf   : > { %1352 = vmatpush1.bf16.msra.mxu1 %v1351_v26  ;;  %1338 = vmatprep.subr.bf16.mxu0 %v1337_v27  ;;  %v1341_v40 = vpack.c.bf16 %v307_v37, %v303_v36  ;;  %v1357_v44 = vpack.c.bf16 %v309_v41, %v305_v38  ;;  %v304_v45 = vld [vmem:[%s2216_s1 + $0xd0] sm:$0xff]  ;;  %v1343_v47 = vpack.c.bf16 %v306_v43, %v302_v42  ;;  %s270_s9 = scalar_lea.vmem %s2215_s0, %s1295_s29  ;;  %s1704_s27 = smov 84   ;;  %vm501_vm9 = vcmask 1014784  }
  0x10   : > { %1354 = vmatprep.subr.bf16.mxu1 %v1353_v31  ;;  %v308_v46 = vld [vmem:[%s2216_s1 + $0xf0] sm:$0xff]  ;;  %v277_v49 = vld [vmem:[%s270_s9] sm:$0xff]  ;;  %s1705_s28 = smov 67   ;;  %vm576_vm10 = vcmask 850944   ;;  %vm606_vm11 = vcmask 711680   ;;  %vm591_vm12 = vcmask 719872  }
  0x11   : > { %v1359_v48 = vpack.c.bf16 %v308_v46, %v304_v45  ;;  %vm873_vm13 = vcmask 588800   ;;  %vm636_vm14 = vcmask 695296   ;;  %vm621_vm15 = vcmask 703488  }
  0x12   : > { %1340 = vmatpush1.bf16.msra.mxu0 %v1339_v35 }
  0x13   : > { %1356 = vmatpush1.bf16.msra.mxu1 %v1355_v39  ;;  %1342 = vmatprep.subr.bf16.mxu0 %v1341_v40 }
  0x14   : > { %1358 = vmatprep.subr.bf16.mxu1 %v1357_v44 }
  0x16   : > { %1344 = vmatpush1.bf16.msra.mxu0 %v1343_v47 }
  0x17   : > { %1360 = vmatpush1.bf16.msra.mxu1 %v1359_v48 }
  0x18   : > { %928 = vmatprep.subr.bf16.mxu1 %v1688_v50 }
  0x19   : > { %1297 = vmatmul.mubr.msk.f32.vlgmr.msra.gmra.mrb[0].mxu0 %vm310_vm0, %v277_v49 }
  0x1a   : > { %1298 = vmatmul.mubr.msk.f32.vlgmr.msra.gmra.mrb[0].mxu1 %vm310_vm0, %v277_v49 }
  0xec   : > { %v1874_v51 = vpop.f32.mrb[0].mxu0 }
  0xed   : > { %v1876_v52 = vpop.f32.mrb[0].mxu1  ;;  %495 = vrot.lane.b32.xlu1 %v1874_v51, %s1689_s10  ;;  %v1880_v53 = vpop.f32.mrb[1].mxu0 }
  0xee   : > { %v1882_v54 = vpop.f32.mrb[1].mxu1  ;;  %v1391_v55 = vpack.i.bf16 %v1876_v52, %v1880_v53  ;;  %v1461_v57 = vpack.i.bf16 %v1880_v53, %v1874_v51 }
  0xef   : > { %v1396_v56 = vpack.i.bf16 %v1874_v51, %v1882_v54  ;;  %v1466_v58 = vpack.i.bf16 %v1882_v54, %v1876_v52  ;;  %v1481_v59 = vpack.i.bf16 %v1882_v54, %v1874_v51 }
  0xf0   : > { %1392 = vrot.lane.b32.xlu0 %v1391_v55, %s1690_s11 }
  0xf1   : > { %1402 = vrot.lane.b32.xlu1 %v1391_v55, %s1691_s21 }
  0xf4   : > { %1397 = vrot.lane.b32.xlu0 %v1396_v56, %s1690_s11 }
  0xf5   : > { %1407 = vrot.lane.b32.xlu1 %v1391_v55, %s1692_s12 }
  0xf8   : > { %1412 = vrot.lane.b32.xlu0 %v1396_v56, %s1691_s21 }
  0xf9   : > { %1417 = vrot.lane.b32.xlu1 %v1396_v56, %s1692_s12 }
  0xfc   : > { %1422 = vrot.lane.b32.xlu0 %v1391_v55, %s1693_s13 }
  0xfd   : > { %1427 = vrot.lane.b32.xlu1 %v1396_v56, %s1693_s13 }
 0x100   : > { %1432 = vrot.lane.b32.xlu0 %v1391_v55, %s1694_s14 }
 0x101   : > { %1437 = vrot.lane.b32.xlu1 %v1396_v56, %s1694_s14 }
 0x104   : > { %1442 = vrot.lane.b32.xlu0 %v1391_v55, %s1695_s15 }
 0x105   : > { %1447 = vrot.lane.b32.xlu1 %v1396_v56, %s1695_s15 }
 0x108   : > { %1452 = vrot.lane.b32.xlu0 %v1391_v55, %s1696_s16 }
 0x109   : > { %1457 = vrot.lane.b32.xlu1 %v1396_v56, %s1696_s16 }
 0x10c   : > { %1462 = vrot.lane.b32.xlu0 %v1461_v57, %s1697_s17 }
 0x10d   : > { %1467 = vrot.lane.b32.xlu1 %v1466_v58, %s1697_s17 }
 0x110   : > { %1472 = vrot.lane.b32.xlu0 %v1391_v55, %s1689_s10 }
 0x111   : > { %1482 = vrot.lane.b32.xlu1 %v1481_v59, %s1698_s18 }
 0x114   : > { %1477 = vrot.lane.b32.xlu0 %v1391_v55, %s1698_s18 }
 0x115   : > { %1492 = vrot.lane.b32.xlu1 %v1391_v55, %s1699_s19 }
 0x118   : > { %1487 = vrot.lane.b32.xlu0 %v1391_v55, %s1700_s20 }
 0x119   : > { %1502 = vrot.lane.b32.xlu1 %v1481_v59, %s1699_s19 }
 0x11c   : > { %1497 = vrot.lane.b32.xlu0 %v1481_v59, %s1700_s20 }
 0x11d   : > { %1512 = vrot.lane.b32.xlu1 %v1391_v55, %s1701_s22 }
 0x120   : > { %1507 = vrot.lane.b32.xlu0 %v1391_v55, %s1702_s23 }
 0x121   : > { %1522 = vrot.lane.b32.xlu1 %v1481_v59, %s1701_s22 }
 0x124   : > { %1517 = vrot.lane.b32.xlu0 %v1481_v59, %s1702_s23 }
 0x125   : > { %1532 = vrot.lane.b32.xlu1 %v1391_v55, %s1703_s26 }
 0x128   : > { %1527 = vrot.lane.b32.xlu0 %v1391_v55, %s1704_s27 }
 0x129   : > { %1542 = vrot.lane.b32.xlu1 %v1481_v59, %s1703_s26 }
 0x12c   : > { %1537 = vrot.lane.b32.xlu0 %v1481_v59, %s1704_s27 }
 0x130   : > { %1547 = vrot.lane.b32.xlu0 %v1391_v55, %s1705_s28 }
 0x15f   : > { %v1912_v60 = vpop.permute.xlu1 %495 }
 0x162   : > { %v1393_v61 = vpop.permute.xlu0 %1392 }
 0x163   : > { %v1914_v62 = vunpack.i.h.bf16 %v1393_v61  ;;  %v1394_v63 = vunpack.i.l.bf16 %v1393_v61  ;;  %v1403_v0 = vpop.permute.xlu1 %1402 }
 0x164   : > { %v1405_v2 = vunpack.i.h.bf16 %v1403_v0  ;;  %v1404_v3 = vunpack.i.l.bf16 %v1403_v0 }
 0x165   : > { %v823_v1 = vpack.c.bf16 %v1914_v62, %v1876_v52  ;;  %v1920_v4 = vsel %vm465_vm1, %v1394_v63, %v1914_v62 }
 0x166   : > { %v1922_v5 = vpop.permute.xlu0 %1397  ;;  %v822_v6 = vpack.c.bf16 %v1920_v4, %v1880_v53  ;;  %v479_v15 = vsel %vm477_vm2, %v1404_v3, %v1405_v2 }
 0x167   : > { %v1400_v8 = vunpack.i.h.bf16 %v1922_v5  ;;  %v1399_v9 = vunpack.i.l.bf16 %v1922_v5  ;;  %v1408_v10 = vpop.permute.xlu1 %1407  ;;  %929 = vmatpush1.bf16.msra.mxu1 %v823_v1 }
 0x168   : > { %v1928_v11 = vunpack.i.h.bf16 %v1408_v10  ;;  %v1409_v12 = vunpack.i.l.bf16 %v1408_v10  ;;  %887 = vmatprep.subr.bf16.mxu0 %v822_v6  ;;  %930 = vmatprep.subr.bf16.mxu1 %v1688_v50 }
 0x169   : > { %v1551_v13 = vpack.i.bf16 %v1399_v9, %v1882_v54  ;;  %v466_v14 = vsel %vm465_vm1, %v1400_v8, %v1394_v63 }
 0x16a   : > { %v826_v16 = vpack.c.bf16 %v1928_v11, %v1405_v2  ;;  %v1413_v17 = vpop.permute.xlu0 %1412  ;;  %v1576_v18 = vpack.i.bf16 %v466_v14, %v1874_v51  ;;  %v821_v19 = vpack.c.bf16 %v466_v14, %v1874_v51  ;;  %v1941_v20 = vsel %vm489_vm3, %v1409_v12, %v1928_v11 }
 0x16b   : > { %v1415_v21 = vunpack.i.h.bf16 %v1413_v17  ;;  %v1414_v22 = vunpack.i.l.bf16 %v1413_v17  ;;  %v1943_v23 = vpop.permute.xlu1 %1417  ;;  %1552 = vrot.lane.b32.xlu1 %v1551_v13, %s1705_s28  ;;  %v825_v24 = vpack.c.bf16 %v1941_v20, %v479_v15  ;;  %v675_v14 = vsel %vm465_vm1, %v1914_v62, %v1399_v9 }
 0x16c   : > { %v1420_v25 = vunpack.i.h.bf16 %v1943_v23  ;;  %v1419_v26 = vunpack.i.l.bf16 %v1943_v23  ;;  %931 = vmatpush1.bf16.msra.mxu1 %v826_v16  ;;  %1577 = vrot.lane.b32.xlu0 %v1576_v18, %s1705_s28  ;;  %v1571_v62 = vpack.i.bf16 %v675_v14, %v1920_v4 }
 0x16d   : > { %v478_v27 = vsel %vm477_vm2, %v1415_v21, %v1404_v3  ;;  %888 = vmatpush1.bf16.msra.mxu0 %v821_v19  ;;  %v678_v28 = vsel %vm477_vm2, %v1405_v2, %v1414_v22  ;;  %932 = vmatprep.subr.bf16.mxu1 %v1688_v50 }
 0x16e   : > { %v490_v29 = vsel %vm489_vm3, %v1420_v25, %v1409_v12  ;;  %v1556_v30 = vpack.i.bf16 %v1419_v26, %v1414_v22  ;;  %889 = vmatprep.subr.bf16.mxu0 %v825_v24  ;;  %v1954_v31 = vpop.permute.xlu0 %1422  ;;  %v1581_v32 = vpack.i.bf16 %v678_v28, %v479_v15  ;;  %v681_v15 = vsel %vm489_vm3, %v1928_v11, %v1419_v26 }
 0x16f   : > { %v824_v33 = vpack.c.bf16 %v490_v29, %v478_v27  ;;  %v1956_v34 = vpop.permute.xlu1 %1427  ;;  %v1591_v36 = vpack.i.bf16 %v490_v29, %v478_v27  ;;  %v1424_v44 = vunpack.i.l.bf16 %v1954_v31  ;;  %v1425_v10 = vunpack.i.h.bf16 %v1954_v31 }
 0x170   : > { %1557 = vrot.lane.b32.xlu1 %v1556_v30, %s1705_s28  ;;  %1582 = vrot.lane.b32.xlu0 %v1581_v32, %s1705_s28  ;;  %v1429_v40 = vunpack.i.l.bf16 %v1956_v34  ;;  %v1430_v45 = vunpack.i.h.bf16 %v1956_v34  ;;  %v1586_v25 = vpack.i.bf16 %v681_v15, %v1941_v20  ;;  %vm666_vm3 = vcmask 556032  }
 0x171   : > { %890 = vmatpush1.bf16.msra.mxu0 %v824_v33  ;;  %v518_v27 = vsel %vm516_vm5, %v1424_v44, %v1425_v10 }
 0x172   : > { %v1433_v35 = vpop.permute.xlu0 %1432  ;;  %v1970_v57 = vsel %vm516_vm5, %v1430_v45, %v1424_v44  ;;  %v519_v26 = vsel %vm516_vm5, %v1425_v10, %v1429_v40 }
 0x173   : > { %v1435_v37 = vunpack.i.h.bf16 %v1433_v35  ;;  %v1434_v38 = vunpack.i.l.bf16 %v1433_v35  ;;  %v1438_v39 = vpop.permute.xlu1 %1437 }
 0x174   : > { %v1440_v41 = vunpack.i.h.bf16 %v1438_v39  ;;  %v1439_v42 = vunpack.i.l.bf16 %v1438_v39  ;;  %1592 = vrot.lane.b32.xlu0 %v1591_v36, %s1705_s28 }
 0x175   : > { %v692_v43 = vsel %vm690_vm4, %v1434_v38, %v1435_v37 }
 0x176   : > { %v1561_v46 = vpack.i.bf16 %v1429_v40, %v1439_v42  ;;  %v1443_v47 = vpop.permute.xlu0 %1442  ;;  %v693_v48 = vsel %vm690_vm4, %v1435_v37, %v1439_v42  ;;  %v691_v55 = vsel %vm690_vm4, %v1440_v41, %v1434_v38  ;;  %vm651_vm4 = vcmask 687104  }
 0x177   : > { %v1445_v49 = vunpack.i.h.bf16 %v1443_v47  ;;  %v1444_v51 = vunpack.i.l.bf16 %v1443_v47  ;;  %v1448_v52 = vpop.permute.xlu1 %1447  ;;  %v1596_v53 = vpack.i.bf16 %v693_v48, %v692_v43  ;;  %v1606_v59 = vpack.i.bf16 %v1970_v57, %v691_v55 }
 0x178   : > { %v1449_v54 = vunpack.i.l.bf16 %v1448_v52  ;;  %1562 = vrot.lane.b32.xlu1 %v1561_v46, %s1705_s28  ;;  %v1450_v3 = vunpack.i.h.bf16 %v1448_v52  ;;  %v1601_v43 = vpack.i.bf16 %v519_v26, %v518_v27 }
 0x179   : > { %1597 = vrot.lane.b32.xlu0 %v1596_v53, %s1705_s28  ;;  %v1974_v61 = vsel %vm531_vm6, %v1444_v51, %v1445_v49 }
 0x17a   : > { %v1453_v56 = vpop.permute.xlu0 %1452  ;;  %v1977_v2 = vsel %vm531_vm6, %v1445_v49, %v1449_v54  ;;  %v532_v9 = vsel %vm531_vm6, %v1450_v3, %v1444_v51 }
 0x17b   : > { %v1458_v58 = vpop.permute.xlu1 %1457  ;;  %v1454_v63 = vunpack.i.l.bf16 %v1453_v56  ;;  %v1611_v13 = vpack.i.bf16 %v1977_v2, %v1974_v61  ;;  %v1455_v21 = vunpack.i.h.bf16 %v1453_v56 }
 0x17c   : > { %v1460_v0 = vunpack.i.h.bf16 %v1458_v58  ;;  %v1459_v1 = vunpack.i.l.bf16 %v1458_v58 }
 0x17d   : > { %1607 = vrot.lane.b32.xlu0 %v1606_v59, %s1705_s28  ;;  %v548_v20 = vsel %vm546_vm7, %v1454_v63, %v1455_v21 }
 0x17e   : > { %v1566_v6 = vpack.i.bf16 %v1459_v1, %v1449_v54  ;;  %v1463_v8 = vpop.permute.xlu0 %1462  ;;  %v1994_v19 = vsel %vm546_vm7, %v1460_v0, %v1454_v63  ;;  %v549_v32 = vsel %vm546_vm7, %v1455_v21, %v1459_v1  ;;  %v831_v41 = vpack.c.bf16 %v548_v20, %v1974_v61  ;;  %v2035_v0 = vld [vmem:[%s2217_s2] sm:$0xff] }
 0x17f   : > { %v1981_v12 = vpop.permute.xlu1 %1467  ;;  %v1465_v16 = vunpack.i.h.bf16 %v1463_v8  ;;  %v1464_v17 = vunpack.i.l.bf16 %v1463_v8  ;;  %v1621_v24 = vpack.i.bf16 %v1994_v19, %v532_v9  ;;  %v832_v42 = vpack.c.bf16 %v549_v32, %v1977_v2 }
 0x180   : > { %v1469_v18 = vunpack.i.l.bf16 %v1981_v12  ;;  %1567 = vrot.lane.b32.xlu1 %v1566_v6, %s1705_s28  ;;  %v1470_v33 = vunpack.i.h.bf16 %v1981_v12  ;;  %v830_v47 = vpack.c.bf16 %v1994_v19, %v532_v9  ;;  %v1616_v2 = vpack.i.bf16 %v549_v32, %v548_v20 }
 0x181   : > { %1612 = vrot.lane.b32.xlu0 %v1611_v13, %s1705_s28  ;;  %v2005_v28 = vsel %vm561_vm8, %v1464_v17, %v1465_v16  ;;  %v1300_v3 = vcombine.high %v2035_v0, %v2035_v0 }
 0x182   : > { %v1473_v5 = vpop.permute.xlu0 %1472  ;;  %v563_v4 = vsel %vm561_vm8, %v1465_v16, %v1469_v18  ;;  %v564_v45 = vsel %vm561_vm8, %v1469_v18, %v1470_v33  ;;  %v861_v18 = vld [vmem:[%s2218_s3] sm:$0xff]  ;;  %vm766_vm8 = vcmask 547840  }
 0x183   : > { %v1475_v11 = vunpack.i.h.bf16 %v1473_v5  ;;  %v1474_v22 = vunpack.i.l.bf16 %v1473_v5  ;;  %v1483_v23 = vpop.permute.xlu1 %1482  ;;  %1302 = vmatprep.mubr.msk.bf16.mxu0 %vm873_vm13, %v1300_v3  ;;  %v1631_v9 = vpack.i.bf16 %v1470_v33, %v564_v45  ;;  %1303 = vmatprep.mubr.msk.bf16.mxu1 %vm873_vm13, %v1300_v3 }
 0x184   : > { %1572 = vrot.lane.b32.xlu1 %v1571_v62, %s1705_s28  ;;  %v1485_v40 = vunpack.i.h.bf16 %v1483_v23  ;;  %v1484_v46 = vunpack.i.l.bf16 %v1483_v23 }
 0x185   : > { %v502_v29 = vsel %vm501_vm9, %v1912_v60, %v1474_v22  ;;  %v829_v30 = vpack.c.bf16 %v519_v26, %v1475_v11  ;;  %1622 = vrot.lane.b32.xlu0 %v1621_v24, %s1705_s28  ;;  %v503_v31 = vsel %vm501_vm9, %v1474_v22, %v1475_v11  ;;  %v1626_v60 = vpack.i.bf16 %v563_v4, %v2005_v28 }
 0x186   : > { %v827_v34 = vpack.c.bf16 %v1970_v57, %v502_v29  ;;  %v1478_v35 = vpop.permute.xlu0 %1477  ;;  %v828_v36 = vpack.c.bf16 %v518_v27, %v503_v31  ;;  %vm877_vm9 = vcmask 1043456  }
 0x187   : > { %v1480_v37 = vunpack.i.h.bf16 %v1478_v35  ;;  %v1479_v38 = vunpack.i.l.bf16 %v1478_v35  ;;  %v1493_v39 = vpop.permute.xlu1 %1492  ;;  %933 = vmatpush1.bf16.msra.mxu1 %v829_v30 }
 0x188   : > { %1587 = vrot.lane.b32.xlu1 %v1586_v25, %s1705_s28  ;;  %891 = vmatprep.subr.bf16.mxu0 %v828_v36  ;;  %v1495_v51 = vunpack.i.h.bf16 %v1493_v39  ;;  %v1494_v52 = vunpack.i.l.bf16 %v1493_v39 }
 0x189   : > { %1627 = vrot.lane.b32.xlu0 %v1626_v60, %s1705_s28  ;;  %892 = vmatpush1.bf16.msra.mxu0 %v827_v34  ;;  %v578_v44 = vsel %vm576_vm10, %v1479_v38, %v1480_v37  ;;  %v579_v48 = vsel %vm576_vm10, %v1480_v37, %v1485_v40  ;;  %v577_v56 = vsel %vm576_vm10, %v1484_v46, %v1479_v38  ;;  %vm1706_vm10 = vmmov 0  }
 0x18a   : > { %v1488_v49 = vpop.permute.xlu0 %1487  ;;  %893 = vmatprep.subr.bf16.mxu0 %v831_v41  ;;  %934 = vmatprep.subr.bf16.mxu1 %v1688_v50  ;;  %v834_v59 = vpack.c.bf16 %v578_v44, %v563_v4  ;;  %v835_v61 = vpack.c.bf16 %v579_v48, %v564_v45  ;;  %v833_v6 = vpack.c.bf16 %v577_v56, %v2005_v28 }
 0x18b   : > { %v1490_v53 = vunpack.i.h.bf16 %v1488_v49  ;;  %v1489_v54 = vunpack.i.l.bf16 %v1488_v49  ;;  %v1503_v55 = vpop.permute.xlu1 %1502  ;;  %935 = vmatpush1.bf16.msra.mxu1 %v832_v42  ;;  %v608_v14 = vsel %vm606_vm11, %v1494_v52, %v1495_v51 }
 0x18c   : > { %v1505_v57 = vunpack.i.h.bf16 %v1503_v55  ;;  %v1504_v58 = vunpack.i.l.bf16 %v1503_v55  ;;  %1602 = vrot.lane.b32.xlu1 %v1601_v43, %s1705_s28  ;;  %936 = vmatprep.subr.bf16.mxu1 %v1688_v50 }
 0x18d   : > { %894 = vmatpush1.bf16.msra.mxu0 %v830_v47  ;;  %v593_v63 = vsel %vm591_vm12, %v1489_v54, %v1490_v53  ;;  %864 = vperm.xlu0 %1636, %v861_v18  }
 0x18e   : > { %v1498_v1 = vpop.permute.xlu0 %1497  ;;  %895 = vmatprep.subr.bf16.mxu0 %v834_v59  ;;  %v607_v15 = vsel %vm606_vm11, %v1504_v58, %v1494_v52  ;;  %v609_v16 = vsel %vm606_vm11, %v1495_v51, %v1505_v57  ;;  %v837_v17 = vpack.c.bf16 %v608_v14, %v593_v63 }
 0x18f   : > { %v1500_v8 = vunpack.i.h.bf16 %v1498_v1  ;;  %v1499_v10 = vunpack.i.l.bf16 %v1498_v1  ;;  %v1513_v13 = vpop.permute.xlu1 %1512  ;;  %937 = vmatpush1.bf16.msra.mxu1 %v835_v61 }
 0x190   : > { %1617 = vrot.lane.b32.xlu1 %v1616_v2, %s1705_s28  ;;  %938 = vmatprep.subr.bf16.mxu1 %v1688_v50  ;;  %v1515_v5 = vunpack.i.h.bf16 %v1513_v13  ;;  %v1514_v62 = vunpack.i.l.bf16 %v1513_v13 }
 0x191   : > { %v592_v19 = vsel %vm591_vm12, %v1499_v10, %v1489_v54  ;;  %v594_v21 = vsel %vm591_vm12, %v1490_v53, %v1500_v8  ;;  %896 = vmatpush1.bf16.msra.mxu0 %v833_v6 }
 0x192   : > { %v836_v11 = vpack.c.bf16 %v607_v15, %v592_v19  ;;  %v838_v22 = vpack.c.bf16 %v609_v16, %v594_v21  ;;  %v1508_v23 = vpop.permute.xlu0 %1507  ;;  %897 = vmatprep.subr.bf16.mxu0 %v837_v17  ;;  %v638_v4 = vsel %vm636_vm14, %v1514_v62, %v1515_v5 }
 0x193   : > { %v1510_v24 = vunpack.i.h.bf16 %v1508_v23  ;;  %v1509_v25 = vunpack.i.l.bf16 %v1508_v23  ;;  %v1523_v26 = vpop.permute.xlu1 %1522 }
 0x194   : > { %v1525_v27 = vunpack.i.h.bf16 %v1523_v26  ;;  %v1524_v28 = vunpack.i.l.bf16 %v1523_v26  ;;  %939 = vmatpush1.bf16.msra.mxu1 %v838_v22  ;;  %1632 = vrot.lane.b32.xlu1 %v1631_v9, %s1705_s28 }
 0x195   : > { %898 = vmatpush1.bf16.msra.mxu0 %v836_v11  ;;  %v623_v12 = vsel %vm621_vm15, %v1509_v25, %v1510_v24  ;;  %940 = vmatprep.subr.bf16.mxu1 %v1688_v50 }
 0x196   : > { %v1518_v29 = vpop.permute.xlu0 %1517  ;;  %v840_v30 = vpack.c.bf16 %v638_v4, %v623_v12  ;;  %v637_v33 = vsel %vm636_vm14, %v1524_v28, %v1514_v62  ;;  %v639_v34 = vsel %vm636_vm14, %v1515_v5, %v1525_v27 }
 0x197   : > { %v1520_v31 = vunpack.i.h.bf16 %v1518_v29  ;;  %v1519_v20 = vunpack.i.l.bf16 %v1518_v29  ;;  %v1533_v32 = vpop.permute.xlu1 %1532 }
 0x198   : > { %899 = vmatprep.subr.bf16.mxu0 %v840_v30  ;;  %v1535_v37 = vunpack.i.h.bf16 %v1533_v32  ;;  %v1534_v38 = vunpack.i.l.bf16 %v1533_v32 }
 0x199   : > { %v622_v35 = vsel %vm621_vm15, %v1519_v20, %v1509_v25  ;;  %v624_v36 = vsel %vm621_vm15, %v1510_v24, %v1520_v31 }
 0x19a   : > { %v839_v39 = vpack.c.bf16 %v637_v33, %v622_v35  ;;  %v841_v60 = vpack.c.bf16 %v639_v34, %v624_v36  ;;  %v1528_v40 = vpop.permute.xlu0 %1527  ;;  %v668_v47 = vsel %vm666_vm3, %v1534_v38, %v1535_v37 }
 0x19b   : > { %v1530_v41 = vunpack.i.h.bf16 %v1528_v40  ;;  %v1529_v42 = vunpack.i.l.bf16 %v1528_v40  ;;  %v1543_v43 = vpop.permute.xlu1 %1542 }
 0x19c   : > { %900 = vmatpush1.bf16.msra.mxu0 %v839_v39  ;;  %941 = vmatpush1.bf16.msra.mxu1 %v841_v60  ;;  %v1545_v44 = vunpack.i.h.bf16 %v1543_v43  ;;  %v1544_v45 = vunpack.i.l.bf16 %v1543_v43 }
 0x19d   : > { %v653_v46 = vsel %vm651_vm4, %v1529_v42, %v1530_v41  ;;  %942 = vmatprep.subr.bf16.mxu1 %v1688_v50 }
 0x19e   : > { %v1538_v48 = vpop.permute.xlu0 %1537  ;;  %v843_v49 = vpack.c.bf16 %v668_v47, %v653_v46  ;;  %v667_v53 = vsel %vm666_vm3, %v1544_v45, %v1534_v38  ;;  %v669_v54 = vsel %vm666_vm3, %v1535_v37, %v1545_v44 }
 0x19f   : > { %v1540_v51 = vunpack.i.h.bf16 %v1538_v48  ;;  %v1539_v52 = vunpack.i.l.bf16 %v1538_v48 }
 0x1a0   : > { %901 = vmatprep.subr.bf16.mxu0 %v843_v49 }
 0x1a1   : > { %v652_v55 = vsel %vm651_vm4, %v1539_v52, %v1529_v42  ;;  %v654_v56 = vsel %vm651_vm4, %v1530_v41, %v1540_v51 }
 0x1a2   : > { %v842_v57 = vpack.c.bf16 %v667_v53, %v652_v55  ;;  %v844_v58 = vpack.c.bf16 %v669_v54, %v654_v56  ;;  %v1548_v59 = vpop.permute.xlu0 %1547 }
 0x1a3   : > { %v1550_v13 = vunpack.i.h.bf16 %v1548_v59  ;;  %v1549_v14 = vunpack.i.l.bf16 %v1548_v59 }
 0x1a4   : > { %902 = vmatpush1.bf16.msra.mxu0 %v842_v57  ;;  %943 = vmatpush1.bf16.msra.mxu1 %v844_v58 }
 0x1a5   : > { %944 = vmatprep.subr.bf16.mxu1 %v1688_v50  ;;  %v768_v5 = vsel %vm766_vm8, %v1549_v14, %v1550_v13 }
 0x1dd   : > { %v1553_v1 = vpop.permute.xlu1 %1552 }
 0x1de   : > { %v1578_v61 = vpop.permute.xlu0 %1577  ;;  %v1554_v15 = vunpack.i.l.bf16 %v1553_v1  ;;  %v1555_v62 = vunpack.i.h.bf16 %v1553_v1 }
 0x1df   : > { %v1579_v16 = vunpack.i.l.bf16 %v1578_v61  ;;  %v1580_v11 = vunpack.i.h.bf16 %v1578_v61 }
 0x1e0   : > { %v769_v9 = vsel %vm766_vm8, %v1550_v13, %v1554_v15 }
 0x1e1   : > { %v767_v22 = vsel %vm766_vm8, %v1579_v16, %v1549_v14 }
 0x1e2   : > { %v1583_v63 = vpop.permute.xlu0 %1582  ;;  %v1558_v3 = vpop.permute.xlu1 %1557 }
 0x1e3   : > { %v1559_v19 = vunpack.i.l.bf16 %v1558_v3  ;;  %v1585_v21 = vunpack.i.h.bf16 %v1583_v63  ;;  %v1560_v24 = vunpack.i.h.bf16 %v1558_v3  ;;  %v1584_v25 = vunpack.i.l.bf16 %v1583_v63 }
 0x1e5   : > { %v775_v31 = vsel %vm766_vm8, %v1585_v21, %v1559_v19  ;;  %v774_v41 = vsel %vm766_vm8, %v1584_v25, %v1585_v21 }
 0x1e6   : > { %v1593_v2 = vpop.permute.xlu0 %1592 }
 0x1e7   : > { %v1594_v12 = vunpack.i.l.bf16 %v1593_v2  ;;  %v1595_v39 = vunpack.i.h.bf16 %v1593_v2 }
 0x1e9   : > { %v773_v42 = vsel %vm766_vm8, %v1594_v12, %v1584_v25 }
 0x1ea   : > { %v2070_v8 = vpop.permute.xlu1 %1562 }
 0x1eb   : > { %v1598_v6 = vpop.permute.xlu0 %1597  ;;  %v1564_v4 = vunpack.i.l.bf16 %v2070_v8  ;;  %v1565_v43 = vunpack.i.h.bf16 %v2070_v8 }
 0x1ec   : > { %v1600_v29 = vunpack.i.h.bf16 %v1598_v6  ;;  %v1599_v30 = vunpack.i.l.bf16 %v1598_v6 }
 0x1ee   : > { %v781_v44 = vsel %vm766_vm8, %v1600_v29, %v1564_v4  ;;  %v780_v45 = vsel %vm766_vm8, %v1599_v30, %v1600_v29 }
 0x1ef   : > { %v2072_v10 = vpop.permute.xlu0 %1607 }
 0x1f0   : > { %v1609_v34 = vunpack.i.l.bf16 %v2072_v10  ;;  %v1610_v46 = vunpack.i.h.bf16 %v2072_v10 }
 0x1f2   : > { %v2074_v17 = vpop.permute.xlu1 %1567  ;;  %v779_v52 = vsel %vm766_vm8, %v1609_v34, %v1599_v30 }
 0x1f3   : > { %v2076_v18 = vpop.permute.xlu0 %1612  ;;  %v1569_v57 = vunpack.i.l.bf16 %v2074_v17  ;;  %v1570_v13 = vunpack.i.h.bf16 %v2074_v17 }
 0x1f4   : > { %v1615_v58 = vunpack.i.h.bf16 %v2076_v18  ;;  %v1614_v63 = vunpack.i.l.bf16 %v2076_v18 }
 0x1f6   : > { %v1573_v23 = vpop.permute.xlu1 %1572  ;;  %v787_v19 = vsel %vm766_vm8, %v1615_v58, %v1569_v57 }
 0x1f7   : > { %v1575_v26 = vunpack.i.h.bf16 %v1573_v23  ;;  %v1574_v27 = vunpack.i.l.bf16 %v1573_v23  ;;  %v2081_v28 = vpop.permute.xlu0 %1622 }
 0x1f8   : > { %v1624_v1 = vunpack.i.l.bf16 %v2081_v28  ;;  %v1625_v21 = vunpack.i.h.bf16 %v2081_v28 }
 0x1f9   : > { %v772_v20 = vsel %vm766_vm8, %v1575_v26, %v1555_v62  ;;  %v770_v32 = vsel %vm766_vm8, %v1580_v11, %v1574_v27  ;;  %v771_v33 = vsel %vm766_vm8, %v1574_v27, %v1575_v26  ;;  %v786_v11 = vsel %vm766_vm8, %v1614_v63, %v1615_v58 }
 0x1fa   : > { %v847_v35 = vpack.c.bf16 %v772_v20, %v769_v9  ;;  %v845_v36 = vpack.c.bf16 %v770_v32, %v767_v22  ;;  %v1588_v37 = vpop.permute.xlu1 %1587  ;;  %v846_v38 = vpack.c.bf16 %v771_v33, %v768_v5  ;;  %v785_v9 = vsel %vm766_vm8, %v1624_v1, %v1614_v63 }
 0x1fb   : > { %v1590_v60 = vunpack.i.h.bf16 %v1588_v37  ;;  %v1589_v40 = vunpack.i.l.bf16 %v1588_v37  ;;  %v1628_v49 = vpop.permute.xlu0 %1627 }
 0x1fc   : > { %903 = vmatprep.subr.bf16.mxu0 %v846_v38  ;;  %945 = vmatpush1.bf16.msra.mxu1 %v847_v35  ;;  %v1630_v2 = vunpack.i.h.bf16 %v1628_v49  ;;  %v1629_v3 = vunpack.i.l.bf16 %v1628_v49  ;;  %v1299_v35 = vcombine.low %v2035_v0, %v2035_v0 }
 0x1fd   : > { %v778_v47 = vsel %vm766_vm8, %v1590_v60, %v1560_v24  ;;  %v776_v48 = vsel %vm766_vm8, %v1595_v39, %v1589_v40  ;;  %904 = vmatpush1.bf16.msra.mxu0 %v845_v36  ;;  %946 = vmatprep.subr.bf16.mxu1 %v1688_v50  ;;  %v777_v51 = vsel %vm766_vm8, %v1589_v40, %v1590_v60  ;;  %v973_v36 = vlaneseq  ;;  %v971_v60 = vld [vmem:[%s2219_s4] sm:$0x7] }
 0x1fe   : > { %v848_v53 = vpack.c.bf16 %v776_v48, %v773_v42  ;;  %v850_v54 = vpack.c.bf16 %v778_v47, %v775_v31  ;;  %v1603_v55 = vpop.permute.xlu1 %1602  ;;  %v849_v56 = vpack.c.bf16 %v777_v51, %v774_v41  ;;  %v791_v22 = vsel %vm766_vm8, %v1629_v3, %v1630_v2 }
 0x1ff   : > { %v1605_v59 = vunpack.i.h.bf16 %v1603_v55  ;;  %v1604_v61 = vunpack.i.l.bf16 %v1603_v55  ;;  %v857_v29 = vpack.c.bf16 %v791_v22, %v791_v22  ;;  %v974_v37 = vshrl.u32 %v973_v36, 7 }
 0x200   : > { %905 = vmatprep.subr.bf16.mxu0 %v849_v56  ;;  %947 = vmatpush1.bf16.msra.mxu1 %v850_v54 }
 0x201   : > { %v784_v6 = vsel %vm766_vm8, %v1605_v59, %v1565_v43  ;;  %v782_v8 = vsel %vm766_vm8, %v1610_v46, %v1604_v61  ;;  %906 = vmatpush1.bf16.msra.mxu0 %v848_v53  ;;  %948 = vmatprep.subr.bf16.mxu1 %v1688_v50  ;;  %v783_v10 = vsel %vm766_vm8, %v1604_v61, %v1605_v59  ;;  %v879_v33 = vsel %vm877_vm9, %v857_v29, 0 }
 0x202   : > { %v851_v14 = vpack.c.bf16 %v782_v8, %v779_v52  ;;  %v853_v15 = vpack.c.bf16 %v784_v6, %v781_v44  ;;  %v1618_v16 = vpop.permute.xlu1 %1617  ;;  %v852_v18 = vpack.c.bf16 %v783_v10, %v780_v45  ;;  %v975_v38 = vsub.s32 0, %v974_v37 }
 0x203   : > { %v1620_v5 = vunpack.i.h.bf16 %v1618_v16  ;;  %v1619_v62 = vunpack.i.l.bf16 %v1618_v16  ;;  %v983_v49 = vsub.s32 2, %v974_v37  ;;  %v979_v54 = vsub.s32 1, %v974_v37 }
 0x204   : > { %907 = vmatprep.subr.bf16.mxu0 %v852_v18  ;;  %949 = vmatpush1.bf16.msra.mxu1 %v853_v15  ;;  %v976_v0 = vrot.slane %v971_v60, %v975_v38 }
 0x205   : > { %v790_v17 = vsel %vm766_vm8, %v1620_v5, %v1570_v13  ;;  %v788_v23 = vsel %vm766_vm8, %v1625_v21, %v1619_v62  ;;  %908 = vmatpush1.bf16.msra.mxu0 %v851_v14  ;;  %950 = vmatprep.subr.bf16.mxu1 %v1688_v50  ;;  %v789_v24 = vsel %vm766_vm8, %v1619_v62, %v1620_v5 }
 0x206   : > { %v854_v25 = vpack.c.bf16 %v788_v23, %v785_v9  ;;  %v856_v26 = vpack.c.bf16 %v790_v17, %v787_v19  ;;  %v1633_v27 = vpop.permute.xlu1 %1632  ;;  %v855_v28 = vpack.c.bf16 %v789_v24, %v786_v11  ;;  %v984_v56 = vrot.slane %v971_v60, %v983_v49 }
 0x207   : > { %v1635_v12 = vunpack.i.h.bf16 %v1633_v27  ;;  %v1634_v4 = vunpack.i.l.bf16 %v1633_v27  ;;  %v980_v58 = vrot.slane %v971_v60, %v979_v54 }
 0x208   : > { %909 = vmatprep.subr.bf16.mxu0 %v855_v28  ;;  %951 = vmatpush1.bf16.msra.mxu1 %v856_v26 }
 0x209   : > { %v792_v30 = vsel %vm766_vm8, %v1630_v2, %v1634_v4  ;;  %910 = vmatpush1.bf16.msra.mxu0 %v854_v25  ;;  %952 = vmatprep.subr.bf16.mxu1 %v1688_v50  ;;  %v793_v31 = vsel %vm766_vm8, %v1634_v4, %v1635_v12  ;;  %v1098_v2 = vld [vmem:[%s2221_s6] sm:$0xff] }
 0x20a   : > { %v858_v20 = vpack.c.bf16 %v792_v30, %v792_v30  ;;  %v859_v32 = vpack.c.bf16 %v793_v31, %v793_v31 }
 0x20c   : > { %1301 = vmatprep.subr.msk.bf16.mxu0 %vm877_vm9, %v858_v20  ;;  %v885_v34 = vsel %vm877_vm9, %v859_v32, 0  ;;  %v865_v39 = vpop.permute.xlu0 %864 }
 0x20d   : > { %912 = vmatpush1.bf16.msra.mxu0 %v879_v33  ;;  %953 = vmatpush1.bf16.msra.mxu1 %v885_v34 }
 0x20e   : > { %1315 = vmatprep.subr.bf16.mxu1 %v1687_v7 }
 0x210   : > { %920 = vmatmul.mubr.bf16.vlgmr.msra.gmra.mrb[4].mxu0 %v1299_v35  ;;  %961 = vmatmul.mubr.bf16.vlgmr.msra.gmra.mrb[4].mxu1 %v1299_v35 }
 0x211   : > { %1148 = vmatprep.mubr.bf16.mxu0 %v1688_v50  ;;  %1325 = vmatprep.mubr.msk.bf16.mxu1 %vm1706_vm10, %v1687_v7 }
 0x2e3   : > { %v921_v40 = vpop.f32.mrb[4].mxu0  ;;  %v962_v41 = vpop.f32.mrb[4].mxu1 }
 0x2e4   : > { %v2131_v42 = vadd.f32 %v921_v40, %v865_v39  ;;  %v923_v43 = vpop.f32.mrb[5].mxu0  ;;  %v964_v44 = vpop.f32.mrb[5].mxu1  ;;  %v2136_v52 = vadd.f32 %v962_v41, %v865_v39 }
 0x2e5   : > { %v925_v45 = vpop.f32.mrb[6].mxu0  ;;  %v965_v46 = vpop.f32.mrb[6].mxu1  ;;  %v2138_v53 = vadd.f32 %v923_v43, %v865_v39 }
 0x2e6   : > { %v968_v47 = vmax.f32 %v2131_v42, 0.0  ;;  %v926_v50 = vpop.f32.mrb[7].mxu0  ;;  %v966_v48 = vpop.f32.mrb[7].mxu1  ;;  %v970_v55 = vmax.f32 %v2136_v52, 0.0 }
 0x2e7   : > { %v969_v57 = vmax.f32 %v2138_v53, 0.0 }
 0x2e8   : > { %v2134_v51 = vmul.f32 %v976_v0, %v968_v47  ;;  %v990_v59 = vmul.f32 %v984_v56, %v970_v55 }
 0x2e9   : > { %v989_v61 = vmul.f32 %v980_v58, %v969_v57 }
 0x2ea   : > { %1005 = vrot.lane.b32.xlu0 %v2134_v51, %s1691_s21  ;;  %994 = vrot.lane.b32.xlu1 %v2134_v51, %s1690_s11 }
 0x2eb   : > { %v1642_v63 = vpack.i.bf16 %v990_v59, %v989_v61  ;;  %v1672_v1 = vpack.i.bf16 %v989_v61, %v2134_v51 }
 0x2ee   : > { %1027 = vrot.lane.b32.xlu0 %v2134_v51, %s1695_s15  ;;  %1016 = vrot.lane.b32.xlu1 %v2134_v51, %s1693_s13 }
 0x2f2   : > { %1049 = vrot.lane.b32.xlu0 %v2134_v51, %s1700_s20  ;;  %1038 = vrot.lane.b32.xlu1 %v2134_v51, %s1696_s16 }
 0x2f6   : > { %1643 = vrot.lane.b32.xlu0 %v1642_v63, %s1691_s21  ;;  %1060 = vrot.lane.b32.xlu1 %v2134_v51, %s1699_s19 }
 0x2fa   : > { %1653 = vrot.lane.b32.xlu0 %v1642_v63, %s1695_s15  ;;  %1638 = vrot.lane.b32.xlu1 %v1642_v63, %s1690_s11 }
 0x2fe   : > { %1663 = vrot.lane.b32.xlu0 %v1642_v63, %s1700_s20  ;;  %1648 = vrot.lane.b32.xlu1 %v1642_v63, %s1693_s13  ;;  %s1707_s13 = smov 21  }
 0x302   : > { %1673 = vrot.lane.b32.xlu0 %v1672_v1, %s1702_s23  ;;  %1658 = vrot.lane.b32.xlu1 %v1642_v63, %s1696_s16  ;;  %s1361_s16 = smul.u32 24, %s2225_s25 }
 0x304   : > { %s275_s20 = scalar_lea.vmem %s2222_s7, %s1361_s16 }
 0x306   : > { %1101 = vperm.xlu0 %1636, %v1098_v2   ;;  %1668 = vrot.lane.b32.xlu1 %v1642_v63, %s1699_s19 }
 0x30a   : > { %1075 = vrot.lane.b32.xlu1 %v990_v59, %s1702_s23 }
 0x35c   : > { %v1006_v3 = vpop.permute.xlu0 %1005  ;;  %v995_v6 = vpop.permute.xlu1 %994 }
 0x360   : > { %v1028_v8 = vpop.permute.xlu0 %1027  ;;  %v1017_v10 = vpop.permute.xlu1 %1016 }
 0x364   : > { %v1050_v13 = vpop.permute.xlu0 %1049  ;;  %v1039_v14 = vpop.permute.xlu1 %1038 }
 0x368   : > { %v1644_v15 = vpop.permute.xlu0 %1643  ;;  %v1061_v16 = vpop.permute.xlu1 %1060 }
 0x369   : > { %v1645_v62 = vunpack.i.l.bf16 %v1644_v15  ;;  %v1646_v9 = vunpack.i.h.bf16 %v1644_v15 }
 0x36b   : > { %v1011_v4 = vsel %vm477_vm2, %v1006_v3, %v1645_v62  ;;  %v1012_v20 = vsel %vm477_vm2, %v1645_v62, %v1646_v9 }
 0x36c   : > { %v1654_v18 = vpop.permute.xlu0 %1653  ;;  %v1639_v19 = vpop.permute.xlu1 %1638 }
 0x36d   : > { %v1641_v21 = vunpack.i.h.bf16 %v1639_v19  ;;  %v1640_v5 = vunpack.i.l.bf16 %v1639_v19  ;;  %v1655_v27 = vunpack.i.l.bf16 %v1654_v18  ;;  %v1656_v29 = vunpack.i.h.bf16 %v1654_v18 }
 0x36f   : > { %v1084_v11 = vpack.c.bf16 %v1641_v21, %v990_v59  ;;  %v1000_v22 = vsel %vm465_vm1, %v995_v6, %v1640_v5  ;;  %v1001_v17 = vsel %vm465_vm1, %v1640_v5, %v1641_v21  ;;  %v1033_v37 = vsel %vm531_vm6, %v1028_v8, %v1655_v27 }
 0x370   : > { %v1082_v23 = vpack.c.bf16 %v1000_v22, %v2134_v51  ;;  %v1664_v24 = vpop.permute.xlu0 %1663  ;;  %v1649_v25 = vpop.permute.xlu1 %1648  ;;  %v1083_v26 = vpack.c.bf16 %v1001_v17, %v989_v61  ;;  %v1034_v0 = vsel %vm531_vm6, %v1655_v27, %v1656_v29  ;;  %vm1206_vm1 = vcmask 171008  }
 0x371   : > { %v1651_v28 = vunpack.i.h.bf16 %v1649_v25  ;;  %v1650_v12 = vunpack.i.l.bf16 %v1649_v25  ;;  %1316 = vmatpush3.bf16.msra.mxu1 %v1084_v11  ;;  %v1666_v60 = vunpack.i.h.bf16 %v1664_v24  ;;  %v1665_v40 = vunpack.i.l.bf16 %v1664_v24 }
 0x372   : > { %1116 = vmatprep.subr.bf16.mxu0 %v1083_v26  ;;  %1317 = vmatprep.subr.bf16.mxu1 %v1687_v7 }
 0x373   : > { %v1087_v30 = vpack.c.bf16 %v1651_v28, %v1646_v9  ;;  %v1022_v31 = vsel %vm516_vm5, %v1017_v10, %v1650_v12  ;;  %1117 = vmatpush1.bf16.msra.mxu0 %v1082_v23  ;;  %v1023_v32 = vsel %vm516_vm5, %v1650_v12, %v1651_v28  ;;  %v1055_v54 = vsel %vm591_vm12, %v1050_v13, %v1665_v40  ;;  %v1097_v13 = vld [vmem:[%s2220_s5] sm:$0xf] }
 0x374   : > { %v1085_v33 = vpack.c.bf16 %v1022_v31, %v1011_v4  ;;  %v1674_v34 = vpop.permute.xlu0 %1673  ;;  %v1659_v35 = vpop.permute.xlu1 %1658  ;;  %v1086_v36 = vpack.c.bf16 %v1023_v32, %v1012_v20  ;;  %v1056_v55 = vsel %vm591_vm12, %v1665_v40, %v1666_v60 }
 0x375   : > { %v1661_v38 = vunpack.i.h.bf16 %v1659_v35  ;;  %v1660_v39 = vunpack.i.l.bf16 %v1659_v35  ;;  %1318 = vmatpush3.bf16.msra.mxu1 %v1087_v30  ;;  %v1676_v41 = vunpack.i.h.bf16 %v1674_v34  ;;  %v1675_v43 = vunpack.i.l.bf16 %v1674_v34 }
 0x376   : > { %1118 = vmatprep.subr.bf16.mxu0 %v1086_v36  ;;  %1319 = vmatprep.subr.bf16.mxu1 %v1687_v7 }
 0x377   : > { %v1090_v44 = vpack.c.bf16 %v1661_v38, %v1656_v29  ;;  %v1044_v45 = vsel %vm546_vm7, %v1039_v14, %v1660_v39  ;;  %1119 = vmatpush1.bf16.msra.mxu0 %v1085_v33  ;;  %v1045_v46 = vsel %vm546_vm7, %v1660_v39, %v1661_v38  ;;  %v1077_v59 = vsel %vm621_vm15, %v1675_v43, %v1676_v41 }
 0x378   : > { %v1088_v47 = vpack.c.bf16 %v1044_v45, %v1033_v37  ;;  %v1669_v50 = vpop.permute.xlu1 %1668  ;;  %v1089_v48 = vpack.c.bf16 %v1045_v46, %v1034_v0  ;;  %v1094_v8 = vpack.c.bf16 %v1077_v59, %v1077_v59 }
 0x379   : > { %v1671_v49 = vunpack.i.h.bf16 %v1669_v50  ;;  %v1670_v51 = vunpack.i.l.bf16 %v1669_v50  ;;  %1320 = vmatpush3.bf16.msra.mxu1 %v1090_v44 }
 0x37a   : > { %1120 = vmatprep.subr.bf16.mxu0 %v1089_v48  ;;  %1321 = vmatprep.subr.bf16.mxu1 %v1687_v7  ;;  %v1108_v14 = vsel %vm877_vm9, %v1094_v8, 0 }
 0x37b   : > { %v1093_v56 = vpack.c.bf16 %v1671_v49, %v1666_v60  ;;  %v1066_v57 = vsel %vm606_vm11, %v1061_v16, %v1670_v51  ;;  %1121 = vmatpush1.bf16.msra.mxu0 %v1088_v47  ;;  %v1067_v58 = vsel %vm606_vm11, %v1670_v51, %v1671_v49 }
 0x37c   : > { %v1091_v61 = vpack.c.bf16 %v1066_v57, %v1055_v54  ;;  %v1076_v63 = vpop.permute.xlu1 %1075  ;;  %v1092_v1 = vpack.c.bf16 %v1067_v58, %v1056_v55 }
 0x37d   : > { %v1078_v2 = vsel %vm621_vm15, %v1676_v41, %v1076_v63  ;;  %v1096_v3 = vpack.c.bf16 %v1076_v63, %v1076_v63  ;;  %1322 = vmatpush3.bf16.msra.mxu1 %v1093_v56 }
 0x37e   : > { %v1095_v6 = vpack.c.bf16 %v1078_v2, %v1078_v2  ;;  %1122 = vmatprep.subr.bf16.mxu0 %v1092_v1  ;;  %1323 = vmatprep.subr.bf16.mxu1 %v1687_v7 }
 0x37f   : > { %1123 = vmatpush1.bf16.msra.mxu0 %v1091_v61  ;;  %v1114_v10 = vsel %vm877_vm9, %v1096_v3, 0 }
 0x380   : > { %1304 = vmatprep.subr.msk.bf16.mxu0 %vm877_vm9, %v1095_v6 }
 0x381   : > { %1324 = vmatpush3.bf16.msra.mxu1 %v1114_v10 }
 0x383   : > { %1125 = vmatpush1.bf16.msra.mxu0 %v1108_v14 }
 0x384   : > { %1326 = vmatmul.mubr.msk.bf16.vlgmr.msra.gmra.mrb[8].mxu1 %vm873_vm13, %v1097_v13 }
 0x385   : > { %v1102_v7 = vpop.permute.xlu0 %1101 }
 0x386   : > { %1305 = vmatmul.mubr.msk.bf16.vlgmr.msra.gmra.mrb[8].mxu0 %vm873_vm13, %v1097_v13 }
 0x457   : > { %v1191_v15 = vpop.f32.mrb[8].mxu1 }
 0x458   : > { %v1327_v16 = vpop.f32.mrb[9].mxu1  ;;  %v1192_v17 = vadd.f32 %v1191_v15, %v1102_v7 }
 0x459   : > { %v1150_v18 = vpop.f32.mrb[8].mxu0  ;;  %v1194_v19 = vpop.f32.mrb[10].mxu1 }
 0x45a   : > { %v1151_v21 = vadd.f32 %v1150_v18, %v1102_v7  ;;  %v1152_v5 = vpop.f32.mrb[9].mxu0  ;;  %v1328_v62 = vpop.f32.mrb[11].mxu1 }
 0x45b   : > { %v1153_v9 = vadd.f32 %v1152_v5, %v1102_v7  ;;  %v1154_v11 = vpop.f32.mrb[10].mxu0 }
 0x45c   : > { %v1155_v22 = vpop.f32.mrb[11].mxu0  ;;  %1200 = vrot.lane.b32.xlu1 %v1151_v21, %s1707_s13 }
 0x45d   : > { %1202 = vrot.lane.b32.xlu0 %v1153_v9, %s1707_s13 }
 0x460   : > { %1204 = vrot.lane.b32.xlu1 %v1192_v17, %s1707_s13 }
 0x4ce   : > { %v1201_v23 = vpop.permute.xlu1 %1200 }
 0x4cf   : > { %v1212_v24 = vadd.f32 %v1201_v23, %v2131_v42  ;;  %v1203_v25 = vpop.permute.xlu0 %1202 }
 0x4d0   : > { %v1207_v26 = vsel %vm1206_vm1, %v1201_v23, %v1203_v25 }
 0x4d1   : > { %v1215_v27 = vmax.f32 %v1212_v24, 0.0  ;;  %v1213_v28 = vadd.f32 %v1207_v26, %v2138_v53 }
 0x4d2   : > { %v1205_v12 = vpop.permute.xlu1 %1204 }
 0x4d3   : > { %v1216_v4 = vmax.f32 %v1213_v28, 0.0  ;;  %v1208_v29 = vsel %vm1206_vm1, %v1203_v25, %v1205_v12  ;;  %1221 = vrot.lane.b32.xlu0 %v1215_v27, %s1695_s15 }
 0x4d4   : > { %v1214_v30 = vadd.f32 %v1208_v29, %v2136_v52 }
 0x4d5   : > { %1223 = vrot.lane.b32.xlu1 %v1216_v4, %s1695_s15 }
 0x4d6   : > { %v1217_v31 = vmax.f32 %v1214_v30, 0.0 }
 0x4d8   : > { %1225 = vrot.lane.b32.xlu0 %v1217_v31, %s1695_s15 }
 0x545   : > { %v1222_v20 = vpop.permute.xlu0 %1221 }
 0x547   : > { %v1224_v42 = vpop.permute.xlu1 %1223 }
 0x548   : > { %v1227_v53 = vsel %vm531_vm6, %v1222_v20, %v1224_v42 }
 0x549   : > { %1232 = vst [vmem:[%s275_s20] sm:$0xff] %v1227_v53 }
 0x54a   : > { %v1226_v32 = vpop.permute.xlu0 %1225 }
 0x54b   : > { %v1228_v33 = vsel %vm531_vm6, %v1224_v42, %v1226_v32  ;;  %1234 = vst.msk [vmem:[%s275_s20 + $0x10] sm:$0xff] %vm310_vm0, %v1226_v32 }
 0x54c   : > { %1233 = vst [vmem:[%s275_s20 + $0x8] sm:$0xff] %v1228_v33 }
 0x54d PF: > { %s17_s24 = sadd.s32 1, %s1685_s24  }
 0x54e   : > { %p14_p4 = scmp.ge.s32.totalorder %s17_s24, 4  }
 0x550   :  { %16 = sbr.rel (!%p14_p4) target bundleno = 1 (0x1), region = 78 }

</bundles_post_ra>
